<compile_context>
chip_gen: v7x
topology: tpu7x:2x2x1
jax: 0.10.0
libtpu: 0.0.40
codegen_flags: <defaults>
</compile_context>

<pallas_src>
import functools

import jax
import jax.numpy as jnp
from jax.experimental import pallas as pl
from jax.experimental.pallas import tpu as pltpu

LANE = 128


def _round_up(x, m):
    return (x + m - 1) // m * m


def adl_loss_kernel(hyp_ref, x_ref, pt_ref, w_ref, s_ref, lbl_ref, out_ref,
                    *, m_total, tm):
    """One grid step == one lane tile of the folded (batch*sample) axis.

    hyp_ref : (3,)    SMEM f32: [svm_b, alpha, Lambda]
    x_ref   : (D, TM) lane-folded X tile, matmul dtype
    pt_ref  : (K, D)  P^T, resident across the grid, matmul dtype
    w_ref   : (1, K)  SVM weights, f32, resident
    s_ref   : (K, TM) Sparse_Code[batch_order] tile, stored dtype
    lbl_ref : (1, TM) labels tile, f32
    out_ref : (1, TM) per-lane partial loss for this tile (lane-dense store)
    """
    svm_b = hyp_ref[0]
    alpha = hyp_ref[1]
    lam = hyp_ref[2]

    # Analysis codes for this lane tile: (K, D) @ (D, TM) -> (K, TM), f32 acc.
    px = jnp.dot(pt_ref[...], x_ref[...], preferred_element_type=jnp.float32)

    # || P^T X - S ||_F^2 contribution, reduced over atoms only (sublane
    # reduce); the cross-lane reduce is deferred to the wrapper.
    diff = px - s_ref[...].astype(jnp.float32)
    f_lane = jnp.sum(diff * diff, axis=0, keepdims=True)            # (1, TM)

    # SVM scores from the f32 codes (keeps the w contraction in f32 even when
    # the big MXU operands are bf16) + hinge loss.
    scores = jnp.dot(w_ref[...], px, preferred_element_type=jnp.float32) + svm_b
    hinge = jnp.maximum(1.0 - lbl_ref[...] * scores, 0.0)           # (1, TM)

    # Mask padded lanes (zero-padded labels would contribute relu(1-0)=1 each).
    if m_total % tm != 0:
        lane = (jax.lax.broadcasted_iota(jnp.int32, (1, tm), 1)
                + pl.program_id(0) * tm)
        hinge = jnp.where(lane < m_total, hinge, 0.0)

    # NOTE: pow_Length_pi (per-atom squared norms) in the torch forward is dead
    # code (never used in Psi_P) and is omitted.
    out_ref[...] = alpha * f_lane + lam * hinge


def analysis_dict_loss(X, analysis_dict, sparse_code, svm_w, svm_b, label, *,
                       tar_mg, alpha, Lambda, batch_order, relax_factor=None,
                       matmul_dtype=jnp.float32,
                       vmem_tile_budget_bytes=12 << 20):
    """Glue + pallas_call.

    tar_mg and relax_factor are accepted for signature fidelity but are unused
    by the torch forward pass.  svm_b / alpha / Lambda / batch_order may be
    Python scalars or traced JAX scalars (runtime values, not baked constants).

    Tile-size notes (per generation):
      * the default 12 MiB double-buffered tile budget fits every chip's
        default scoped-VMEM limit (v5e 16 MiB / v6e 32 MiB / v7x 32 MiB);
      * v5e/v6e (128 MiB physical VMEM): for large D*K problems raise
        vmem_tile_budget_bytes toward ~96 MiB (vmem_limit_bytes follows it);
      * v7x (64 MiB physical VMEM): keep the double-buffered footprint
        <= ~40-48 MiB; the "parallel" lane-tile grid axis already lets its two
        TensorCores split the tiles.
    """
    del tar_mg, relax_factor
    B, D, N = X.shape
    K = analysis_dict.shape[1]
    M = B * N

    # Lane tile: multiple of 128, sized so the double-buffered X/S/label/out
    # streams stay inside the VMEM budget.
    x_bytes = jnp.dtype(matmul_dtype).itemsize
    s_bytes = jnp.dtype(sparse_code.dtype).itemsize
    per_lane = 2 * (D * x_bytes + K * s_bytes + 4 + 4)   # double-buffered B/lane
    tm = (vmem_tile_budget_bytes // per_lane) // LANE * LANE
    tm = max(LANE, min(tm, _round_up(M, LANE)))
    m_pad = _round_up(M, tm)
    n_tiles = m_pad // tm

    # Lane-dense repack: fold batch into lanes.  Only the single
    # sparse_code[batch_order] slice is touched (no full-tensor gather/cast).
    # Ideally X / S are produced in this (D, B*N) / (K, B*N) layout upstream,
    # which would make even this one-pass transpose disappear.
    xr = jnp.transpose(X, (1, 0, 2)).reshape(D, M).astype(matmul_dtype)
    s_sel = jax.lax.dynamic_index_in_dim(sparse_code, batch_order, axis=0,
                                         keepdims=False)             # (B, K, N)
    sr = jnp.transpose(s_sel, (1, 0, 2)).reshape(K, M)                # stored dtype
    lr = label.reshape(1, M).astype(jnp.float32)

    pad = m_pad - M
    if pad:
        xr = jnp.pad(xr, ((0, 0), (0, pad)))
        sr = jnp.pad(sr, ((0, 0), (0, pad)))
        lr = jnp.pad(lr, ((0, 0), (0, pad)))

    pt_mat = analysis_dict.T.astype(matmul_dtype)                     # (K, D)
    w_row = jnp.reshape(svm_w, (1, K)).astype(jnp.float32)            # (1, K)
    hyp = jnp.stack([jnp.asarray(svm_b, jnp.float32),                 # (3,) SMEM
                     jnp.asarray(alpha, jnp.float32),
                     jnp.asarray(Lambda, jnp.float32)])

    kernel = functools.partial(adl_loss_kernel, m_total=M, tm=tm)

    partials = pl.pallas_call(
        kernel,
        out_shape=jax.ShapeDtypeStruct((1, m_pad), jnp.float32),
        grid_spec=pltpu.PrefetchScalarGridSpec(
            num_scalar_prefetch=0,
            grid=(n_tiles,),
            in_specs=[
                pl.BlockSpec(memory_space=pltpu.MemorySpace.SMEM),    # hyperparams
                pl.BlockSpec((D, tm), lambda t: (0, t)),              # X tile
                pl.BlockSpec((K, D), lambda t: (0, 0)),               # P^T (resident)
                pl.BlockSpec((1, K), lambda t: (0, 0)),               # w    (resident)
                pl.BlockSpec((K, tm), lambda t: (0, t)),              # S tile
                pl.BlockSpec((1, tm), lambda t: (0, t)),              # labels tile
            ],
            out_specs=pl.BlockSpec((1, tm), lambda t: (0, t)),
        ),
        compiler_params=pltpu.CompilerParams(
            # Independent lane tiles -> v7x's two TensorCores split the grid;
            # no-op on the single-TC v5e/v6e.
            dimension_semantics=("parallel",),
            vmem_limit_bytes=min(100 << 20,
                                 max(32 << 20,
                                     vmem_tile_budget_bytes + (16 << 20))),
        ),
    )(hyp, xr, pt_mat, w_row, sr, lr)

    # Single tiny cross-lane reduce of the (1, m_pad) lane partials
    # (padded lanes are exactly zero).
    return jnp.sum(partials)


if __name__ == "__main__":
    key = jax.random.PRNGKey(0)
    k1, k2, k3, k4, k5 = jax.random.split(key, 5)

    # Small shapes consistent with the forward pass.
    B, D, N, K, NB = 2, 16, 8, 32, 3      # batch, feat dim, samples, atoms, #stored batches
    tar_mg, alpha, Lambda = 0.5, 0.1, 0.2
    batch_order, relax_factor = 1, 1.0

    X = jax.random.normal(k1, (B, D, N), jnp.float32)
    analysis_dict = 0.1 * jax.random.normal(k2, (D, K), jnp.float32)       # Analysis_.Analysis_Dict
    sparse_code = 0.1 * jax.random.normal(k3, (NB, B, K, N), jnp.float32)  # Sparse_.Sparse_Code
    svm_w = 0.1 * jax.random.normal(k4, (K,), jnp.float32)                 # SVM_ weights
    svm_b = 0.05                                                           # SVM_ bias
    label = jnp.where(jax.random.bernoulli(k5, 0.5, (B, N)), 1.0, -1.0).astype(jnp.float32)

    # Pure-JAX reference.
    px_ref = jnp.einsum("dk,bdn->bkn", analysis_dict, X)
    f_ref = jnp.sum((px_ref - sparse_code[batch_order]) ** 2)
    scores_ref = jnp.einsum("k,bkn->bn", svm_w, px_ref) + svm_b
    hinge_ref = jnp.sum(jnp.maximum(1.0 - label * scores_ref, 0.0))
    ref = alpha * f_ref + Lambda * hinge_ref

    # f32 MXU operands: tight check.
    out_f32 = analysis_dict_loss(
        X, analysis_dict, sparse_code, svm_w, svm_b, label,
        tar_mg=tar_mg, alpha=alpha, Lambda=Lambda,
        batch_order=batch_order, relax_factor=relax_factor,
        matmul_dtype=jnp.float32)
    out_f32 = jax.block_until_ready(out_f32)
    assert jnp.allclose(out_f32, ref, rtol=1e-4, atol=1e-4), (out_f32, ref)

    # bf16 MXU operands (fast path when X already lives in bf16 upstream);
    # f32 accumulation + f32 w-contraction, looser tolerance.
    out_bf16 = analysis_dict_loss(
        X, analysis_dict, sparse_code, svm_w, svm_b, label,
        tar_mg=tar_mg, alpha=alpha, Lambda=Lambda,
        batch_order=batch_order, relax_factor=relax_factor,
        matmul_dtype=jnp.bfloat16)
    out_bf16 = jax.block_until_ready(out_bf16)
    assert jnp.allclose(out_bf16, ref, rtol=3e-2, atol=3e-2), (out_bf16, ref)

    print("KERNEL_OK")
</pallas_src>

<mosaic_0001>
module attributes {stable_mosaic.version = 11 : i64} {
  func.func @adl_loss_kernel(%arg0: i32, %arg1: memref<3xf32, #tpu.memory_space<smem>>, %arg2: memref<16x128xf32, #tpu.memory_space<vmem>>, %arg3: memref<32x16xf32, #tpu.memory_space<vmem>>, %arg4: memref<1x32xf32, #tpu.memory_space<vmem>>, %arg5: memref<32x128xf32, #tpu.memory_space<vmem>>, %arg6: memref<1x128xf32, #tpu.memory_space<vmem>>, %arg7: memref<1x128xf32, #tpu.memory_space<vmem>>) attributes {dimension_semantics = [#tpu.dimension_semantics<parallel>], iteration_bounds = array<i64: 1>, scalar_prefetch = 0 : i64, scratch_operands = 0 : i64, tpu.core_type = #tpu.core_type<tc>, window_params = [{transform_indices = @transform_0, window_bounds = array<i64: 3>}, {transform_indices = @transform_1, window_bounds = array<i64: 16, 128>}, {pipeline_mode = #tpu.pipeline_mode<synchronous>, transform_indices = @transform_2, window_bounds = array<i64: 32, 16>}, {pipeline_mode = #tpu.pipeline_mode<synchronous>, transform_indices = @transform_3, window_bounds = array<i64: 1, 32>}, {transform_indices = @transform_4, window_bounds = array<i64: 32, 128>}, {transform_indices = @transform_5, window_bounds = array<i64: 1, 128>}, {transform_indices = @transform_6, window_bounds = array<i64: 1, 128>}]} {
    %c0 = arith.constant 0 : index
    %0 = memref.load %arg1[%c0] : memref<3xf32, #tpu.memory_space<smem>>
    %c1 = arith.constant 1 : index
    %1 = memref.load %arg1[%c1] : memref<3xf32, #tpu.memory_space<smem>>
    %c2 = arith.constant 2 : index
    %2 = memref.load %arg1[%c2] : memref<3xf32, #tpu.memory_space<smem>>
    %c0_0 = arith.constant 0 : index
    %c0_1 = arith.constant 0 : index
    %3 = vector.load %arg3[%c0_0, %c0_1] : memref<32x16xf32, #tpu.memory_space<vmem>>, vector<32x16xf32>
    %c0_2 = arith.constant 0 : index
    %c0_3 = arith.constant 0 : index
    %4 = vector.load %arg2[%c0_2, %c0_3] : memref<16x128xf32, #tpu.memory_space<vmem>>, vector<16x128xf32>
    %cst = arith.constant dense<0.000000e+00> : vector<32x128xf32>
    %5 = tpu.matmul %3, %4, %cst {dimension_numbers = #tpu.dot_dimension_numbers<[1], [0], [0], [1], [0, 0, 1, 1], [], []>} : vector<32x16xf32>, vector<16x128xf32>, vector<32x128xf32> -> vector<32x128xf32>
    %c0_4 = arith.constant 0 : index
    %c0_5 = arith.constant 0 : index
    %6 = vector.load %arg5[%c0_4, %c0_5] : memref<32x128xf32, #tpu.memory_space<vmem>>, vector<32x128xf32>
    %7 = arith.subf %5, %6 : vector<32x128xf32>
    %8 = arith.mulf %7, %7 : vector<32x128xf32>
    %cst_6 = arith.constant dense<0.000000e+00> : vector<128xf32>
    %9 = vector.multi_reduction <add>, %8, %cst_6 [0] : vector<32x128xf32> to vector<128xf32>
    %10 = vector.shape_cast %9 : vector<128xf32> to vector<1x128xf32>
    %c0_7 = arith.constant 0 : index
    %c0_8 = arith.constant 0 : index
    %11 = vector.load %arg4[%c0_7, %c0_8] : memref<1x32xf32, #tpu.memory_space<vmem>>, vector<1x32xf32>
    %cst_9 = arith.constant dense<0.000000e+00> : vector<1x128xf32>
    %12 = tpu.matmul %11, %5, %cst_9 {dimension_numbers = #tpu.dot_dimension_numbers<[1], [0], [0], [1], [0, 0, 1, 1], [], []>} : vector<1x32xf32>, vector<32x128xf32>, vector<1x128xf32> -> vector<1x128xf32>
    %13 = vector.broadcast %0 : f32 to vector<1x128xf32>
    %14 = arith.addf %12, %13 : vector<1x128xf32>
    %c0_10 = arith.constant 0 : index
    %c0_11 = arith.constant 0 : index
    %15 = vector.load %arg6[%c0_10, %c0_11] : memref<1x128xf32, #tpu.memory_space<vmem>>, vector<1x128xf32>
    %16 = arith.mulf %15, %14 : vector<1x128xf32>
    %cst_12 = arith.constant 1.000000e+00 : f32
    %17 = vector.broadcast %cst_12 : f32 to vector<1x128xf32>
    %18 = arith.subf %17, %16 : vector<1x128xf32>
    %cst_13 = arith.constant 0.000000e+00 : f32
    %19 = vector.broadcast %cst_13 : f32 to vector<1x128xf32>
    %20 = arith.maximumf %18, %19 : vector<1x128xf32>
    %21 = tpu.iota {dimensions = array<i32: 1>} : vector<1x128xi32>
    %c128_i32 = arith.constant 128 : i32
    %22 = arith.muli %arg0, %c128_i32 : i32
    %23 = vector.broadcast %22 : i32 to vector<1x128xi32>
    %24 = arith.addi %21, %23 : vector<1x128xi32>
    %c16_i32 = arith.constant 16 : i32
    %25 = vector.broadcast %c16_i32 : i32 to vector<1x128xi32>
    %26 = arith.cmpi slt, %24, %25 : vector<1x128xi32>
    %cst_14 = arith.constant 0.000000e+00 : f32
    %27 = vector.broadcast %cst_14 : f32 to vector<1x128xf32>
    %28 = arith.select %26, %20, %27 : vector<1x128xi1>, vector<1x128xf32>
    %29 = vector.broadcast %1 : f32 to vector<1x128xf32>
    %30 = arith.mulf %29, %10 : vector<1x128xf32>
    %31 = vector.broadcast %2 : f32 to vector<1x128xf32>
    %32 = arith.mulf %31, %28 : vector<1x128xf32>
    %33 = arith.addf %30, %32 : vector<1x128xf32>
    %c0_15 = arith.constant 0 : index
    %c0_16 = arith.constant 0 : index
    %34 = vector.load %arg7[%c0_15, %c0_16] : memref<1x128xf32, #tpu.memory_space<vmem>>, vector<1x128xf32>
    tpu.vector_store %arg7[%c0_15, %c0_16], %33 {strides = array<i32>} : memref<1x128xf32, #tpu.memory_space<vmem>>, vector<1x128xf32>,
    return
  }
  func.func @transform_0(%arg0: i32) -> i32 {
    %c0_i32 = arith.constant 0 : i32
    %c0_i32_0 = arith.constant 0 : i32
    return %c0_i32 : i32
  }
  func.func @transform_1(%arg0: i32) -> (i32, i32) {
    %c0_i32 = arith.constant 0 : i32
    %c0_i32_0 = arith.constant 0 : i32
    return %c0_i32, %arg0 : i32, i32
  }
  func.func @transform_2(%arg0: i32) -> (i32, i32) {
    %c0_i32 = arith.constant 0 : i32
    %c0_i32_0 = arith.constant 0 : i32
    %c0_i32_1 = arith.constant 0 : i32
    return %c0_i32, %c0_i32_0 : i32, i32
  }
  func.func @transform_3(%arg0: i32) -> (i32, i32) {
    %c0_i32 = arith.constant 0 : i32
    %c0_i32_0 = arith.constant 0 : i32
    %c0_i32_1 = arith.constant 0 : i32
    return %c0_i32, %c0_i32_0 : i32, i32
  }
  func.func @transform_4(%arg0: i32) -> (i32, i32) {
    %c0_i32 = arith.constant 0 : i32
    %c0_i32_0 = arith.constant 0 : i32
    return %c0_i32, %arg0 : i32, i32
  }
  func.func @transform_5(%arg0: i32) -> (i32, i32) {
    %c0_i32 = arith.constant 0 : i32
    %c0_i32_0 = arith.constant 0 : i32
    return %c0_i32, %arg0 : i32, i32
  }
  func.func @transform_6(%arg0: i32) -> (i32, i32) {
    %c0_i32 = arith.constant 0 : i32
    %c0_i32_0 = arith.constant 0 : i32
    return %c0_i32, %arg0 : i32, i32
  }
}

</mosaic_0001>

<bundles_post_ra>
// kernel: tpu_custom_call.1
= control target key start
LH: loop header
LB: loop body
LE: loop exit
PB: predicated region body
PF: predicated region fallthrough
CT: control target
= control target key end

     0   :  { %11 = vsyncpa [#allocation4], 0  ;;  %s456_s0 = inlined_call_operand.vmem [shape: f32[3], index: 0, kind: input, shape index: {}]   ;;  %s457_s1 = inlined_call_operand.vmem [shape: f32[16,128], index: 1, kind: input, shape index: {}]   ;;  %s458_s2 = inlined_call_operand.vmem [shape: f32[32,16], index: 2, kind: input, shape index: {}]   ;;  %s459_s3 = inlined_call_operand.vmem [shape: f32[1,32], index: 3, kind: input, shape index: {}]   ;;  %s460_s4 = inlined_call_operand.vmem [shape: f32[32,128], index: 4, kind: input, shape index: {}]   ;;  %s461_s5 = inlined_call_operand.vmem [shape: f32[1,128], index: 5, kind: input, shape index: {}]   ;;  %s462_s6 = inlined_call_operand.hbm [shape: f32[1,128], index: 6, kind: output, shape index: {}]  }
   0x1   :  { %12 = vsyncpa [#allocation3], 0  ;;  %s19_s23 = sshll.u32 %s456_s0, 4  ;;  %s20_s23 = int_to_ptr.vmem [resolvable:$true] %s19_s23 }
   0x2   :  { %s327_s24 = scalar_lea.vmem %s20_s23, 16  ;;  %p332_p1 = scmp.lt.s32.totalorder %s20_s23, %s20_s23 }
   0x3   :  { %p328_p0 = scmp.ne.s32.totalorder %s20_s23, %s327_s24  ;;  %p333_p2 = scmp.lt.s32.totalorder %s327_s24, %s327_s24 }
   0x5   :  { %p334_p3 = por %p333_p2, %p332_p1 }
   0x7   :  { %p335_p4 = pnand %p334_p3, %p328_p0 }
   0x9   :  { %338 = shalt.err (!%p335_p4)
}
   0xa   :  { %s365_s25 = smov [#allocation2]  }
   0xb   :  { %22 = dma.vmem_to_smem %s20_s23, 16, %s365_s25, [#allocation4]  }
   0xc   :  { %361 = dma.done.wait [#allocation4], 16  }
   0xd   :  { %362 = vsyncadd [#allocation4], 4294967280 }
   0xe   :  { %36 = sfence }
   0xf   :  { %v44_v0 = vld [vmem:[%s457_s1] sm:$0xff]  ;;  %v45_v1 = vld [vmem:[%s457_s1 + $0x8] sm:$0xff]  ;;  %vm46_vm0 = vcmask 130048   ;;  %v42_v5 = vld [vmem:[%s458_s2 + $0x10] sm:$0xff]  ;;  %v366_v7 = vmov 0.0|0.0   ;;  %vm367_vm1 = vmmov 0   ;;  %v245_v36 = vlaneseq }
  0x10   :  { %v40_v2 = vld [vmem:[%s458_s2] sm:$0xff]  ;;  %v312_v3 = vpack.c.bf16 %v45_v1, %v44_v0  ;;  %v41_v4 = vld [vmem:[%s458_s2 + $0x8] sm:$0xff]  ;;  %v43_v6 = vld [vmem:[%s458_s2 + $0x18] sm:$0xff]  ;;  %316 = vmatprep.subr.bf16.mxu1 %v366_v7  ;;  %v368_v8 = vmov 0.0   ;;  %vm167_vm2 = vcmask 261120   ;;  %s273_s21 = sld [smem:[#allocation2 + $0x1]] }
  0x11   :  { %295 = vmatprep.mubr.msk.f32.mxu0 %vm46_vm0, %v40_v2  ;;  %309 = vmatprep.mubr.msk.f32.mxu1 %vm367_vm1, %v368_v8  ;;  %v145_v9 = vld [vmem:[%s460_s4 + $0x8] sm:$0xff]  ;;  %v144_v10 = vld [vmem:[%s460_s4] sm:$0xff]  ;;  %v147_v17 = vld [vmem:[%s460_s4 + $0x18] sm:$0xff]  ;;  %s274_s22 = sld [smem:[#allocation2 + $0x2]]  ;;  %v246_v42 = vand.u32 127, %v245_v36 }
  0x12   :  { %313 = vmatprep.subr.bf16.mxu0 %v312_v3  ;;  %v146_v18 = vld [vmem:[%s460_s4 + $0x10] sm:$0xff]  ;;  %v165_v27 = vld [vmem:[%s459_s3] sm:$0x1]  ;;  %s37_s4 = sld [smem:[#allocation2]]  ;;  %s369_s3 = smov [#allocation5]  }
  0x13   :  { %315 = vmatpush3.bf16.msra.mxu0 %v312_v3  ;;  %v241_v38 = vld [vmem:[%s461_s5] sm:$0x1]  ;;  %vm250_vm3 = vcmp.lt.s32.totalorder %v246_v42, 16  ;;  %s264_s25 = sshll.u32 %s369_s3, 4  ;;  %s265_s25 = int_to_ptr.vmem [resolvable:$true] %s264_s25 }
  0x14   :  { %s339_s5 = scalar_lea.vmem %s265_s25, 16  ;;  %s343_s26 = scalar_lea.vmem %s265_s25, 32 }
  0x15   :  { %p340_p5 = scmp.ne.s32.totalorder %s265_s25, %s339_s5  ;;  %p344_p6 = scmp.lt.s32.totalorder %s265_s25, %s265_s25 }
  0x16   :  { %296 = vmatmul.mubr.msk.f32.vlgmr.msra.gmra.mrb[0].mxu0 %vm46_vm0, %v41_v4  ;;  %v252_v47 = vstv %s273_s21  ;;  %p345_p7 = scmp.lt.s32.totalorder %s343_s26, %s339_s5 }
  0x17   :  { %298 = vmatprep.mubr.msk.f32.mxu0 %vm46_vm0, %v42_v5  ;;  %v254_v48 = vstv %s274_s22 }
  0x18   :  { %v166_v34 = vstv %s37_s4  ;;  %p346_p8 = por %p345_p7, %p344_p6 }
  0x1a   :  { %299 = vmatmul.mubr.msk.f32.gmra.mrb[2].mxu0 %vm46_vm0, %v43_v6  ;;  %p347_p9 = pnand %p346_p8, %p340_p5 }
  0xe9   :  { %v297_v11 = vpop.f32.mrb[0].mxu0 }
  0xea   :  { %v149_v12 = vsub.f32 %v297_v11, %v145_v9  ;;  %v125_v13 = vpop.f32.mrb[1].mxu0 }
  0xeb   :  { %v148_v14 = vsub.f32 %v125_v13, %v144_v10  ;;  %v317_v15 = vpack.c.bf16 %v297_v11, %v125_v13 }
  0xec   :  { %v153_v16 = vmul.f32 %v149_v12, %v149_v12 }
  0xed   :  { %v152_v19 = vmul.f32 %v148_v14, %v148_v14  ;;  %v300_v20 = vpop.f32.mrb[2].mxu0  ;;  %318 = vmatpush3.bf16.msra.mxu1 %v317_v15 }
  0xee   :  { %v135_v21 = vpop.f32.mrb[3].mxu0  ;;  %319 = vmatprep.subr.bf16.mxu1 %v366_v7  ;;  %v151_v23 = vsub.f32 %v300_v20, %v147_v17 }
  0xef   :  { %v156_v22 = vadd.f32 %v153_v16, %v152_v19  ;;  %v150_v24 = vsub.f32 %v135_v21, %v146_v18  ;;  %v320_v25 = vpack.c.bf16 %v300_v20, %v135_v21 }
  0xf0   :  { %v155_v28 = vmul.f32 %v151_v23, %v151_v23 }
  0xf1   :  { %v154_v26 = vmul.f32 %v150_v24, %v150_v24  ;;  %321 = vmatpush3.bf16.msra.mxu1 %v320_v25 }
  0xf3   :  { %v157_v29 = vadd.f32 %v156_v22, %v154_v26 }
  0xf4   :  { %310 = vmatmul.mubr.msk.f32.vlgmr.msra.gmra.mrb[0].mxu1 %vm167_vm2, %v165_v27 }
  0xf5   :  { %v158_v30 = vadd.f32 %v157_v29, %v155_v28 }
  0xf7   :  { %v159_v31 = vrot.slane %v158_v30, 4 }
  0xf9   :  { %v160_v32 = vadd.f32 %v159_v31, %v158_v30 }
  0xfb   :  { %v161_v33 = vrot.slane %v160_v32, 2 }
  0xfd   :  { %v162_v35 = vadd.f32 %v161_v33, %v160_v32 }
  0xff   :  { %v163_v41 = vrot.slane %v162_v35, 1 }
 0x101   :  { %v164_v45 = vadd.f32 %v163_v41, %v162_v35 }
 0x103   :  { %v253_v50 = vmul.f32 %v252_v47, %v164_v45 }
 0x1c7   :  { %v237_v37 = vpop.f32.mrb[0].mxu1 }
 0x1c8   :  { %v238_v39 = vadd.f32 %v237_v37, %v166_v34  ;;  %v311_v40 = vpop.f32.mrb[1].mxu1 }
 0x1ca   :  { %v242_v43 = vmul.f32 %v241_v38, %v238_v39 }
 0x1cc   :  { %v243_v44 = vsub.f32 1.0, %v242_v43 }
 0x1ce   :  { %v244_v46 = vmax.f32 %v243_v44, 0.0 }
 0x1d0   :  { %v251_v49 = vsel %vm250_vm3, %v244_v46, 0.0 }
 0x1d1   :  { %v255_v51 = vmul.f32 %v254_v48, %v251_v49 }
 0x1d3   :  { %v256_v52 = vadd.f32 %v255_v51, %v253_v50 }
 0x1d5   :  { %257 = vst [vmem:[#allocation5] sm:$0x1] %v256_v52 }
 0x1d6   :  { %350 = shalt.err (!%p347_p9)
}
 0x1d7   :  { %s351_s29 = scalar_lea.hbm %s462_s6, 16 }
 0x1d8   :  { %p352_p10 = scmp.ne.s32.totalorder %s462_s6, %s351_s29  ;;  %p355_p11 = scmp.lt.u32.totalorder %s351_s29, %s462_s6 }
 0x1da   :  { %p357_p12 = pnand %p355_p11, %p352_p10 }
 0x1dc   :  { %360 = shalt.err (!%p357_p12)
}
 0x1dd   :  { %267 = dma.vmem_to_hbm [thread:$0]  %s265_s25, 16, %s462_s6, [#allocation3]  }
 0x1de   :  { %363 = dma.done.wait [#allocation3], 16  }
 0x1df   :  { %364 = vsyncadd [#allocation3], 4294967280 }
 0x1e0   :  { %271 = vsyncpa [#allocation3], 1 }
 0x1e1   :  { %272 = vsyncpa [#allocation4], 1 }

</bundles_post_ra>
